<compile_context>
chip_gen: v5e
topology: v5e:2x2
jax: 0.10.0
libtpu: 0.0.40
codegen_flags: <defaults>
</compile_context>

<pallas_src>
import functools

import jax
import jax.numpy as jnp
from jax.experimental import pallas as pl
from jax.experimental.pallas import tpu as pltpu

LANE = 128        # TPU lane width (last dim of a vreg)
SUBLANE_F32 = 8   # f32 sublane rows per vreg
SUBLANE_BF16 = 16 # bf16 packs 16 rows per sublane group


def _round_up(x, m):
    return ((x + m - 1) // m) * m


def _pad2d(x, rows, cols):
    """Zero-pad a 2-D array up to (rows, cols)."""
    r, c = x.shape
    return jnp.pad(x, ((0, rows - r), (0, cols - c)))


# ---------------------------------------------------------------------------
# Kernel: the entire 4-layer MLP fused, one invocation per batch tile.
# Weights (and the streamed input tile) may be bf16; every dot accumulates in
# f32 and tanh / bias adds are done in f32.
# ---------------------------------------------------------------------------
def decoder_kernel(y_ref,
                   w1_ref, b1_ref,
                   w2_ref, b2_ref,
                   w3_ref, b3_ref,
                   w4_ref, b4_ref,
                   o_ref):
    wdt = w1_ref.dtype
    h = jnp.tanh(
        jnp.dot(y_ref[...], w1_ref[...], preferred_element_type=jnp.float32)
        + b1_ref[...])
    h = jnp.tanh(
        jnp.dot(h.astype(wdt), w2_ref[...], preferred_element_type=jnp.float32)
        + b2_ref[...])
    h = jnp.tanh(
        jnp.dot(h.astype(wdt), w3_ref[...], preferred_element_type=jnp.float32)
        + b3_ref[...])
    out = (jnp.dot(h.astype(wdt), w4_ref[...], preferred_element_type=jnp.float32)
           + b4_ref[...])
    o_ref[...] = out.astype(o_ref.dtype)


# ---------------------------------------------------------------------------
# One-time parameter preparation (hoisted out of the jitted forward):
# lane-pad all feature dims to multiples of 128 and cast weights to bf16.
# Zero-padding keeps the math exact: padded weight rows/cols are 0, so padded
# hidden units stay tanh(0)=0 and contribute nothing downstream.
# ---------------------------------------------------------------------------
def prepare_params(params, *, use_bf16=True):
    n_in, n_hidden = params["w1"].shape
    n_out = params["w4"].shape[1]

    n_in_p = _round_up(n_in, LANE)
    n_h_p = _round_up(n_hidden, LANE)
    n_out_p = _round_up(n_out, LANE)

    wdt = jnp.bfloat16 if use_bf16 else jnp.float32
    # TODO(synk): offer fp8 (float8_e4m3) weights on v7x to double the hidden
    # size that stays resident in its 64 MiB VMEM.

    prepared = {
        "w1": _pad2d(params["w1"].astype(jnp.float32), n_in_p, n_h_p).astype(wdt),
        "w2": _pad2d(params["w2"].astype(jnp.float32), n_h_p, n_h_p).astype(wdt),
        "w3": _pad2d(params["w3"].astype(jnp.float32), n_h_p, n_h_p).astype(wdt),
        "w4": _pad2d(params["w4"].astype(jnp.float32), n_h_p, n_out_p).astype(wdt),
        "b1": _pad2d(params["b1"].astype(jnp.float32), 1, n_h_p),
        "b2": _pad2d(params["b2"].astype(jnp.float32), 1, n_h_p),
        "b3": _pad2d(params["b3"].astype(jnp.float32), 1, n_h_p),
        "b4": _pad2d(params["b4"].astype(jnp.float32), 1, n_out_p),
    }
    prepared = jax.tree_util.tree_map(jax.device_put, prepared)
    return prepared, n_out


# ---------------------------------------------------------------------------
# Forward pass.
# ---------------------------------------------------------------------------
@functools.partial(
    jax.jit,
    static_argnames=("n_out", "tile_m", "out_bf16", "single_buffer_weights"))
def decoder_forward(y, prepared, *, n_out, tile_m=256, out_bf16=False,
                    single_buffer_weights=True):
    """y: (B, n_input) float32.  `prepared`/`n_out` come from prepare_params."""
    B, _ = y.shape
    n_in_p, n_h_p = prepared["w1"].shape
    n_out_p = prepared["w4"].shape[1]

    wdt = prepared["w1"].dtype
    wbytes = jnp.dtype(wdt).itemsize
    act_dt = wdt                                   # stream input in weight dtype
    out_dt = jnp.bfloat16 if out_bf16 else jnp.float32

    # Batch tile: large (amortizes ~0.35us/step pipeline overhead), aligned to
    # the dtype's sublane packing, and split so the grid has >=2 steps whenever
    # the batch allows (v7x has 2 TensorCores; "parallel" axis shards them).
    align = SUBLANE_BF16 if wbytes == 2 else SUBLANE_F32
    half_b = -(-B // 2)
    tm = min(_round_up(tile_m, align), max(align, _round_up(half_b, align)))
    B_p = _round_up(B, tm)
    grid = (B_p // tm,)

    y_p = _pad2d(y, B_p, n_in_p).astype(act_dt)

    # VMEM budget: resident weights/biases + double-buffered y/out tiles + a
    # few f32 intermediates, with ~25% headroom.  Floor at the 16 MiB scoped
    # default, cap at v7x's 64 MiB physical VMEM.
    weights_bytes = (n_in_p * n_h_p + 2 * n_h_p * n_h_p + n_h_p * n_out_p) * wbytes
    if not single_buffer_weights:
        weights_bytes *= 2
    bias_bytes = (3 * n_h_p + n_out_p) * 4
    io_bytes = (2 * tm * n_in_p * jnp.dtype(act_dt).itemsize
                + 2 * tm * n_out_p * jnp.dtype(out_dt).itemsize)
    interm_bytes = 4 * tm * n_h_p * 4
    vmem_limit = int(1.25 * (weights_bytes + bias_bytes + io_bytes + interm_bytes))
    vmem_limit = max(vmem_limit, 16 * 1024 * 1024)
    vmem_limit = min(vmem_limit, 64 * 1024 * 1024)
    # TODO(synk): if single-buffered weights exceed ~48 MiB (large n_hidden on
    # v7x), add a fallback that tiles w2/w3 along the hidden dim with an extra
    # "arbitrary" grid axis and an f32 accumulator scratch.

    def resident(arr):
        # Constant index map -> the block never changes, so it is DMA'd once
        # and stays resident; single-buffering halves its VMEM footprint.
        if single_buffer_weights:
            return pl.BlockSpec(arr.shape, lambda i: (0, 0),
                                pipeline_mode=pl.Buffered(1))
        return pl.BlockSpec(arr.shape, lambda i: (0, 0))

    in_specs = [
        pl.BlockSpec((tm, n_in_p), lambda i: (i, 0)),
        resident(prepared["w1"]), resident(prepared["b1"]),
        resident(prepared["w2"]), resident(prepared["b2"]),
        resident(prepared["w3"]), resident(prepared["b3"]),
        resident(prepared["w4"]), resident(prepared["b4"]),
    ]
    out_specs = pl.BlockSpec((tm, n_out_p), lambda i: (i, 0))

    out_p = pl.pallas_call(
        decoder_kernel,
        out_shape=jax.ShapeDtypeStruct((B_p, n_out_p), out_dt),
        grid=grid,
        in_specs=in_specs,
        out_specs=out_specs,
        compiler_params=pltpu.CompilerParams(
            dimension_semantics=("parallel",),
            vmem_limit_bytes=vmem_limit),
    )(y_p,
      prepared["w1"], prepared["b1"],
      prepared["w2"], prepared["b2"],
      prepared["w3"], prepared["b3"],
      prepared["w4"], prepared["b4"])

    # Slice away batch / lane padding (no extra cast: out_dt is already final).
    return out_p[:B, :n_out]


# ---------------------------------------------------------------------------
# Reference + init (mirror the PyTorch module: weights ~ N(0, 0.1), biases 0).
# ---------------------------------------------------------------------------
def init_decoder_params(key, n_input, n_hidden, n_output):
    ks = jax.random.split(key, 4)
    dims = [(n_input, n_hidden), (n_hidden, n_hidden),
            (n_hidden, n_hidden), (n_hidden, n_output)]
    params = {}
    for idx, (k, (din, dout)) in enumerate(zip(ks, dims), start=1):
        params[f"w{idx}"] = (0.1 * jax.random.normal(k, (din, dout))).astype(jnp.float32)
        params[f"b{idx}"] = jnp.zeros((1, dout), dtype=jnp.float32)
    return params


def decoder_reference(y, params):
    h = jnp.tanh(y @ params["w1"] + params["b1"])
    h = jnp.tanh(h @ params["w2"] + params["b2"])
    h = jnp.tanh(h @ params["w3"] + params["b3"])
    return h @ params["w4"] + params["b4"]


def _run_forward(y, prepared, n_out, **kw):
    """Call the forward; if single-buffered weight specs are rejected by the
    installed JAX, fall back to default (double) buffering."""
    try:
        return jax.block_until_ready(
            decoder_forward(y, prepared, n_out=n_out,
                            single_buffer_weights=True, **kw))
    except Exception:
        return jax.block_until_ready(
            decoder_forward(y, prepared, n_out=n_out,
                            single_buffer_weights=False, **kw))


if __name__ == "__main__":
    key = jax.random.PRNGKey(0)
    k_param, k_in = jax.random.split(key)

    # Small shapes consistent with Decoder(n_input, n_hidden, n_output).
    n_input, n_hidden, n_output = 8, 32, 8
    batch = 16

    params = init_decoder_params(k_param, n_input, n_hidden, n_output)
    y = jax.random.normal(k_in, (batch, n_input), dtype=jnp.float32)

    ref = decoder_reference(y, params)

    # f32-weight path: matches the reference tightly.
    prep_f32, n_out = prepare_params(params, use_bf16=False)
    out_f32 = _run_forward(y, prep_f32, n_out)
    assert out_f32.shape == (batch, n_output)
    assert jnp.allclose(out_f32, ref, atol=1e-5, rtol=1e-5), "f32 mismatch vs reference"

    # bf16-weight path (default, MXU-friendly): relaxed tolerance.
    prep_bf16, n_out = prepare_params(params, use_bf16=True)
    out_bf16 = _run_forward(y, prep_bf16, n_out)
    assert out_bf16.shape == (batch, n_output)
    assert jnp.allclose(out_bf16, ref, atol=2e-2, rtol=2e-2), "bf16 mismatch vs reference"

    print("KERNEL_OK")
</pallas_src>

<mosaic_0001>
module attributes {stable_mosaic.version = 11 : i64} {
  func.func @decoder_kernel(%arg0: i32, %arg1: memref<8x128xf32, #tpu.memory_space<vmem>>, %arg2: memref<128x128xf32, #tpu.memory_space<vmem>>, %arg3: memref<1x128xf32, #tpu.memory_space<vmem>>, %arg4: memref<128x128xf32, #tpu.memory_space<vmem>>, %arg5: memref<1x128xf32, #tpu.memory_space<vmem>>, %arg6: memref<128x128xf32, #tpu.memory_space<vmem>>, %arg7: memref<1x128xf32, #tpu.memory_space<vmem>>, %arg8: memref<128x128xf32, #tpu.memory_space<vmem>>, %arg9: memref<1x128xf32, #tpu.memory_space<vmem>>, %arg10: memref<8x128xf32, #tpu.memory_space<vmem>>) attributes {dimension_semantics = [#tpu.dimension_semantics<parallel>], iteration_bounds = array<i64: 2>, scalar_prefetch = 0 : i64, scratch_operands = 0 : i64, tpu.core_type = #tpu.core_type<tc>, window_params = [{transform_indices = @transform_0, window_bounds = array<i64: 8, 128>}, {pipeline_mode = #tpu.pipeline_mode<synchronous>, transform_indices = @transform_1, window_bounds = array<i64: 128, 128>}, {pipeline_mode = #tpu.pipeline_mode<synchronous>, transform_indices = @transform_2, window_bounds = array<i64: 1, 128>}, {pipeline_mode = #tpu.pipeline_mode<synchronous>, transform_indices = @transform_3, window_bounds = array<i64: 128, 128>}, {pipeline_mode = #tpu.pipeline_mode<synchronous>, transform_indices = @transform_4, window_bounds = array<i64: 1, 128>}, {pipeline_mode = #tpu.pipeline_mode<synchronous>, transform_indices = @transform_5, window_bounds = array<i64: 128, 128>}, {pipeline_mode = #tpu.pipeline_mode<synchronous>, transform_indices = @transform_6, window_bounds = array<i64: 1, 128>}, {pipeline_mode = #tpu.pipeline_mode<synchronous>, transform_indices = @transform_7, window_bounds = array<i64: 128, 128>}, {pipeline_mode = #tpu.pipeline_mode<synchronous>, transform_indices = @transform_8, window_bounds = array<i64: 1, 128>}, {transform_indices = @transform_9, window_bounds = array<i64: 8, 128>}]} {
    %c0 = arith.constant 0 : index
    %c0_0 = arith.constant 0 : index
    %0 = vector.load %arg1[%c0, %c0_0] : memref<8x128xf32, #tpu.memory_space<vmem>>, vector<8x128xf32>
    %c0_1 = arith.constant 0 : index
    %c0_2 = arith.constant 0 : index
    %1 = vector.load %arg2[%c0_1, %c0_2] : memref<128x128xf32, #tpu.memory_space<vmem>>, vector<128x128xf32>
    %cst = arith.constant dense<0.000000e+00> : vector<8x128xf32>
    %2 = tpu.matmul %0, %1, %cst {dimension_numbers = #tpu.dot_dimension_numbers<[1], [0], [0], [1], [0, 0, 1, 1], [], []>} : vector<8x128xf32>, vector<128x128xf32>, vector<8x128xf32> -> vector<8x128xf32>
    %c0_3 = arith.constant 0 : index
    %c0_4 = arith.constant 0 : index
    %3 = vector.load %arg3[%c0_3, %c0_4] : memref<1x128xf32, #tpu.memory_space<vmem>>, vector<1x128xf32>
    %4 = vector.broadcast %3 : vector<1x128xf32> to vector<8x128xf32>
    %5 = arith.addf %2, %4 : vector<8x128xf32>
    %6 = math.tanh %5 : vector<8x128xf32>
    %c0_5 = arith.constant 0 : index
    %c0_6 = arith.constant 0 : index
    %7 = vector.load %arg4[%c0_5, %c0_6] : memref<128x128xf32, #tpu.memory_space<vmem>>, vector<128x128xf32>
    %cst_7 = arith.constant dense<0.000000e+00> : vector<8x128xf32>
    %8 = tpu.matmul %6, %7, %cst_7 {dimension_numbers = #tpu.dot_dimension_numbers<[1], [0], [0], [1], [0, 0, 1, 1], [], []>} : vector<8x128xf32>, vector<128x128xf32>, vector<8x128xf32> -> vector<8x128xf32>
    %c0_8 = arith.constant 0 : index
    %c0_9 = arith.constant 0 : index
    %9 = vector.load %arg5[%c0_8, %c0_9] : memref<1x128xf32, #tpu.memory_space<vmem>>, vector<1x128xf32>
    %10 = vector.broadcast %9 : vector<1x128xf32> to vector<8x128xf32>
    %11 = arith.addf %8, %10 : vector<8x128xf32>
    %12 = math.tanh %11 : vector<8x128xf32>
    %c0_10 = arith.constant 0 : index
    %c0_11 = arith.constant 0 : index
    %13 = vector.load %arg6[%c0_10, %c0_11] : memref<128x128xf32, #tpu.memory_space<vmem>>, vector<128x128xf32>
    %cst_12 = arith.constant dense<0.000000e+00> : vector<8x128xf32>
    %14 = tpu.matmul %12, %13, %cst_12 {dimension_numbers = #tpu.dot_dimension_numbers<[1], [0], [0], [1], [0, 0, 1, 1], [], []>} : vector<8x128xf32>, vector<128x128xf32>, vector<8x128xf32> -> vector<8x128xf32>
    %c0_13 = arith.constant 0 : index
    %c0_14 = arith.constant 0 : index
    %15 = vector.load %arg7[%c0_13, %c0_14] : memref<1x128xf32, #tpu.memory_space<vmem>>, vector<1x128xf32>
    %16 = vector.broadcast %15 : vector<1x128xf32> to vector<8x128xf32>
    %17 = arith.addf %14, %16 : vector<8x128xf32>
    %18 = math.tanh %17 : vector<8x128xf32>
    %c0_15 = arith.constant 0 : index
    %c0_16 = arith.constant 0 : index
    %19 = vector.load %arg8[%c0_15, %c0_16] : memref<128x128xf32, #tpu.memory_space<vmem>>, vector<128x128xf32>
    %cst_17 = arith.constant dense<0.000000e+00> : vector<8x128xf32>
    %20 = tpu.matmul %18, %19, %cst_17 {dimension_numbers = #tpu.dot_dimension_numbers<[1], [0], [0], [1], [0, 0, 1, 1], [], []>} : vector<8x128xf32>, vector<128x128xf32>, vector<8x128xf32> -> vector<8x128xf32>
    %c0_18 = arith.constant 0 : index
    %c0_19 = arith.constant 0 : index
    %21 = vector.load %arg9[%c0_18, %c0_19] : memref<1x128xf32, #tpu.memory_space<vmem>>, vector<1x128xf32>
    %22 = vector.broadcast %21 : vector<1x128xf32> to vector<8x128xf32>
    %23 = arith.addf %20, %22 : vector<8x128xf32>
    %c0_20 = arith.constant 0 : index
    %c0_21 = arith.constant 0 : index
    %24 = vector.load %arg10[%c0_20, %c0_21] : memref<8x128xf32, #tpu.memory_space<vmem>>, vector<8x128xf32>
    tpu.vector_store %arg10[%c0_20, %c0_21], %23 {strides = array<i32>} : memref<8x128xf32, #tpu.memory_space<vmem>>, vector<8x128xf32>,
    return
  }
  func.func @transform_0(%arg0: i32) -> (i32, i32) {
    %c0_i32 = arith.constant 0 : i32
    %c0_i32_0 = arith.constant 0 : i32
    return %arg0, %c0_i32 : i32, i32
  }
  func.func @transform_1(%arg0: i32) -> (i32, i32) {
    %c0_i32 = arith.constant 0 : i32
    %c0_i32_0 = arith.constant 0 : i32
    %c0_i32_1 = arith.constant 0 : i32
    return %c0_i32, %c0_i32_0 : i32, i32
  }
  func.func @transform_2(%arg0: i32) -> (i32, i32) {
    %c0_i32 = arith.constant 0 : i32
    %c0_i32_0 = arith.constant 0 : i32
    %c0_i32_1 = arith.constant 0 : i32
    return %c0_i32, %c0_i32_0 : i32, i32
  }
  func.func @transform_3(%arg0: i32) -> (i32, i32) {
    %c0_i32 = arith.constant 0 : i32
    %c0_i32_0 = arith.constant 0 : i32
    %c0_i32_1 = arith.constant 0 : i32
    return %c0_i32, %c0_i32_0 : i32, i32
  }
  func.func @transform_4(%arg0: i32) -> (i32, i32) {
    %c0_i32 = arith.constant 0 : i32
    %c0_i32_0 = arith.constant 0 : i32
    %c0_i32_1 = arith.constant 0 : i32
    return %c0_i32, %c0_i32_0 : i32, i32
  }
  func.func @transform_5(%arg0: i32) -> (i32, i32) {
    %c0_i32 = arith.constant 0 : i32
    %c0_i32_0 = arith.constant 0 : i32
    %c0_i32_1 = arith.constant 0 : i32
    return %c0_i32, %c0_i32_0 : i32, i32
  }
  func.func @transform_6(%arg0: i32) -> (i32, i32) {
    %c0_i32 = arith.constant 0 : i32
    %c0_i32_0 = arith.constant 0 : i32
    %c0_i32_1 = arith.constant 0 : i32
    return %c0_i32, %c0_i32_0 : i32, i32
  }
  func.func @transform_7(%arg0: i32) -> (i32, i32) {
    %c0_i32 = arith.constant 0 : i32
    %c0_i32_0 = arith.constant 0 : i32
    %c0_i32_1 = arith.constant 0 : i32
    return %c0_i32, %c0_i32_0 : i32, i32
  }
  func.func @transform_8(%arg0: i32) -> (i32, i32) {
    %c0_i32 = arith.constant 0 : i32
    %c0_i32_0 = arith.constant 0 : i32
    %c0_i32_1 = arith.constant 0 : i32
    return %c0_i32, %c0_i32_0 : i32, i32
  }
  func.func @transform_9(%arg0: i32) -> (i32, i32) {
    %c0_i32 = arith.constant 0 : i32
    %c0_i32_0 = arith.constant 0 : i32
    return %arg0, %c0_i32 : i32, i32
  }
}

module attributes {stable_mosaic.version = 11 : i64} {
  func.func @decoder_kernel(%arg0: i32, %arg1: memref<8x128xf32, #tpu.memory_space<vmem>>, %arg2: memref<128x128xf32, #tpu.memory_space<vmem>>, %arg3: memref<1x128xf32, #tpu.memory_space<vmem>>, %arg4: memref<128x128xf32, #tpu.memory_space<vmem>>, %arg5: memref<1x128xf32, #tpu.memory_space<vmem>>, %arg6: memref<128x128xf32, #tpu.memory_space<vmem>>, %arg7: memref<1x128xf32, #tpu.memory_space<vmem>>, %arg8: memref<128x128xf32, #tpu.memory_space<vmem>>, %arg9: memref<1x128xf32, #tpu.memory_space<vmem>>, %arg10: memref<8x128xf32, #tpu.memory_space<vmem>>) attributes {dimension_semantics = [#tpu.dimension_semantics<parallel>], iteration_bounds = array<i64: 2>, scalar_prefetch = 0 : i64, scratch_operands = 0 : i64, tpu.core_type = #tpu.core_type<tc>, window_params = [{transform_indices = @transform_0, window_bounds = array<i64: 8, 128>}, {pipeline_mode = #tpu.pipeline_mode<synchronous>, transform_indices = @transform_1, window_bounds = array<i64: 128, 128>}, {pipeline_mode = #tpu.pipeline_mode<synchronous>, transform_indices = @transform_2, window_bounds = array<i64: 1, 128>}, {pipeline_mode = #tpu.pipeline_mode<synchronous>, transform_indices = @transform_3, window_bounds = array<i64: 128, 128>}, {pipeline_mode = #tpu.pipeline_mode<synchronous>, transform_indices = @transform_4, window_bounds = array<i64: 1, 128>}, {pipeline_mode = #tpu.pipeline_mode<synchronous>, transform_indices = @transform_5, window_bounds = array<i64: 128, 128>}, {pipeline_mode = #tpu.pipeline_mode<synchronous>, transform_indices = @transform_6, window_bounds = array<i64: 1, 128>}, {pipeline_mode = #tpu.pipeline_mode<synchronous>, transform_indices = @transform_7, window_bounds = array<i64: 128, 128>}, {pipeline_mode = #tpu.pipeline_mode<synchronous>, transform_indices = @transform_8, window_bounds = array<i64: 1, 128>}, {transform_indices = @transform_9, window_bounds = array<i64: 8, 128>}]} {
    %c0 = arith.constant 0 : index
    %c0_0 = arith.constant 0 : index
    %0 = vector.load %arg1[%c0, %c0_0] : memref<8x128xf32, #tpu.memory_space<vmem>>, vector<8x128xf32>
    %c0_1 = arith.constant 0 : index
    %c0_2 = arith.constant 0 : index
    %1 = vector.load %arg2[%c0_1, %c0_2] : memref<128x128xf32, #tpu.memory_space<vmem>>, vector<128x128xf32>
    %cst = arith.constant dense<0.000000e+00> : vector<8x128xf32>
    %2 = tpu.matmul %0, %1, %cst {dimension_numbers = #tpu.dot_dimension_numbers<[1], [0], [0], [1], [0, 0, 1, 1], [], []>} : vector<8x128xf32>, vector<128x128xf32>, vector<8x128xf32> -> vector<8x128xf32>
    %c0_3 = arith.constant 0 : index
    %c0_4 = arith.constant 0 : index
    %3 = vector.load %arg3[%c0_3, %c0_4] : memref<1x128xf32, #tpu.memory_space<vmem>>, vector<1x128xf32>
    %4 = vector.broadcast %3 : vector<1x128xf32> to vector<8x128xf32>
    %5 = arith.addf %2, %4 : vector<8x128xf32>
    %6 = math.tanh %5 : vector<8x128xf32>
    %c0_5 = arith.constant 0 : index
    %c0_6 = arith.constant 0 : index
    %7 = vector.load %arg4[%c0_5, %c0_6] : memref<128x128xf32, #tpu.memory_space<vmem>>, vector<128x128xf32>
    %cst_7 = arith.constant dense<0.000000e+00> : vector<8x128xf32>
    %8 = tpu.matmul %6, %7, %cst_7 {dimension_numbers = #tpu.dot_dimension_numbers<[1], [0], [0], [1], [0, 0, 1, 1], [], []>} : vector<8x128xf32>, vector<128x128xf32>, vector<8x128xf32> -> vector<8x128xf32>
    %c0_8 = arith.constant 0 : index
    %c0_9 = arith.constant 0 : index
    %9 = vector.load %arg5[%c0_8, %c0_9] : memref<1x128xf32, #tpu.memory_space<vmem>>, vector<1x128xf32>
    %10 = vector.broadcast %9 : vector<1x128xf32> to vector<8x128xf32>
    %11 = arith.addf %8, %10 : vector<8x128xf32>
    %12 = math.tanh %11 : vector<8x128xf32>
    %c0_10 = arith.constant 0 : index
    %c0_11 = arith.constant 0 : index
    %13 = vector.load %arg6[%c0_10, %c0_11] : memref<128x128xf32, #tpu.memory_space<vmem>>, vector<128x128xf32>
    %cst_12 = arith.constant dense<0.000000e+00> : vector<8x128xf32>
    %14 = tpu.matmul %12, %13, %cst_12 {dimension_numbers = #tpu.dot_dimension_numbers<[1], [0], [0], [1], [0, 0, 1, 1], [], []>} : vector<8x128xf32>, vector<128x128xf32>, vector<8x128xf32> -> vector<8x128xf32>
    %c0_13 = arith.constant 0 : index
    %c0_14 = arith.constant 0 : index
    %15 = vector.load %arg7[%c0_13, %c0_14] : memref<1x128xf32, #tpu.memory_space<vmem>>, vector<1x128xf32>
    %16 = vector.broadcast %15 : vector<1x128xf32> to vector<8x128xf32>
    %17 = arith.addf %14, %16 : vector<8x128xf32>
    %18 = math.tanh %17 : vector<8x128xf32>
    %c0_15 = arith.constant 0 : index
    %c0_16 = arith.constant 0 : index
    %19 = vector.load %arg8[%c0_15, %c0_16] : memref<128x128xf32, #tpu.memory_space<vmem>>, vector<128x128xf32>
    %cst_17 = arith.constant dense<0.000000e+00> : vector<8x128xf32>
    %20 = tpu.matmul %18, %19, %cst_17 {dimension_numbers = #tpu.dot_dimension_numbers<[1], [0], [0], [1], [0, 0, 1, 1], [], []>} : vector<8x128xf32>, vector<128x128xf32>, vector<8x128xf32> -> vector<8x128xf32>
    %c0_18 = arith.constant 0 : index
    %c0_19 = arith.constant 0 : index
    %21 = vector.load %arg9[%c0_18, %c0_19] : memref<1x128xf32, #tpu.memory_space<vmem>>, vector<1x128xf32>
    %22 = vector.broadcast %21 : vector<1x128xf32> to vector<8x128xf32>
    %23 = arith.addf %20, %22 : vector<8x128xf32>
    %c0_20 = arith.constant 0 : index
    %c0_21 = arith.constant 0 : index
    %24 = vector.load %arg10[%c0_20, %c0_21] : memref<8x128xf32, #tpu.memory_space<vmem>>, vector<8x128xf32>
    tpu.vector_store %arg10[%c0_20, %c0_21], %23 {strides = array<i32>} : memref<8x128xf32, #tpu.memory_space<vmem>>, vector<8x128xf32>,
    return
  }
  func.func @transform_0(%arg0: i32) -> (i32, i32) {
    %c0_i32 = arith.constant 0 : i32
    %c0_i32_0 = arith.constant 0 : i32
    return %arg0, %c0_i32 : i32, i32
  }
  func.func @transform_1(%arg0: i32) -> (i32, i32) {
    %c0_i32 = arith.constant 0 : i32
    %c0_i32_0 = arith.constant 0 : i32
    %c0_i32_1 = arith.constant 0 : i32
    return %c0_i32, %c0_i32_0 : i32, i32
  }
  func.func @transform_2(%arg0: i32) -> (i32, i32) {
    %c0_i32 = arith.constant 0 : i32
    %c0_i32_0 = arith.constant 0 : i32
    %c0_i32_1 = arith.constant 0 : i32
    return %c0_i32, %c0_i32_0 : i32, i32
  }
  func.func @transform_3(%arg0: i32) -> (i32, i32) {
    %c0_i32 = arith.constant 0 : i32
    %c0_i32_0 = arith.constant 0 : i32
    %c0_i32_1 = arith.constant 0 : i32
    return %c0_i32, %c0_i32_0 : i32, i32
  }
  func.func @transform_4(%arg0: i32) -> (i32, i32) {
    %c0_i32 = arith.constant 0 : i32
    %c0_i32_0 = arith.constant 0 : i32
    %c0_i32_1 = arith.constant 0 : i32
    return %c0_i32, %c0_i32_0 : i32, i32
  }
  func.func @transform_5(%arg0: i32) -> (i32, i32) {
    %c0_i32 = arith.constant 0 : i32
    %c0_i32_0 = arith.constant 0 : i32
    %c0_i32_1 = arith.constant 0 : i32
    return %c0_i32, %c0_i32_0 : i32, i32
  }
  func.func @transform_6(%arg0: i32) -> (i32, i32) {
    %c0_i32 = arith.constant 0 : i32
    %c0_i32_0 = arith.constant 0 : i32
    %c0_i32_1 = arith.constant 0 : i32
    return %c0_i32, %c0_i32_0 : i32, i32
  }
  func.func @transform_7(%arg0: i32) -> (i32, i32) {
    %c0_i32 = arith.constant 0 : i32
    %c0_i32_0 = arith.constant 0 : i32
    %c0_i32_1 = arith.constant 0 : i32
    return %c0_i32, %c0_i32_0 : i32, i32
  }
  func.func @transform_8(%arg0: i32) -> (i32, i32) {
    %c0_i32 = arith.constant 0 : i32
    %c0_i32_0 = arith.constant 0 : i32
    %c0_i32_1 = arith.constant 0 : i32
    return %c0_i32, %c0_i32_0 : i32, i32
  }
  func.func @transform_9(%arg0: i32) -> (i32, i32) {
    %c0_i32 = arith.constant 0 : i32
    %c0_i32_0 = arith.constant 0 : i32
    return %arg0, %c0_i32 : i32, i32
  }
}

</mosaic_0001>

<bundles_post_ra>
// kernel: decoder_forward.1
= control target key start
LH: loop header
LB: loop body
LE: loop exit
PB: predicated region body
PF: predicated region fallthrough
CT: control target
= control target key end

     0   :  { %14 = vsyncpa [#allocation3], 0  ;;  %s1015_s0 = inlined_call_operand.vmem [shape: f32[16,128], index: 0, kind: input, shape index: {}]   ;;  %s1016_s1 = inlined_call_operand.hbm [shape: f32[128,128], index: 1, kind: input, shape index: {}]   ;;  %s1017_s2 = inlined_call_operand.vmem [shape: f32[1,128], index: 2, kind: input, shape index: {}]   ;;  %s1018_s3 = inlined_call_operand.hbm [shape: f32[128,128], index: 3, kind: input, shape index: {}]   ;;  %s1019_s4 = inlined_call_operand.vmem [shape: f32[1,128], index: 4, kind: input, shape index: {}]   ;;  %s1020_s5 = inlined_call_operand.hbm [shape: f32[128,128], index: 5, kind: input, shape index: {}]   ;;  %s1021_s6 = inlined_call_operand.vmem [shape: f32[1,128], index: 6, kind: input, shape index: {}]   ;;  %s1022_s7 = inlined_call_operand.hbm [shape: f32[128,128], index: 7, kind: input, shape index: {}]   ;;  %s1023_s8 = inlined_call_operand.vmem [shape: f32[1,128], index: 8, kind: input, shape index: {}]   ;;  %s1024_s9 = inlined_call_operand.vmem [shape: f32[16,128], index: 9, kind: output, shape index: {}]  }
   0x1   :  { %15 = vsyncpa [#allocation5], 0 }
   0x2   :  { %16 = vsyncpa [#allocation8], 0  ;;  %s928_s30 = smov 0  }
   0x3 LB: > { %s934_s10 = sadd.s32 4294967295, %s870_s30   ;;  %p656_p0 = scmp.ge.s32.totalorder %s870_s30, 1  ;;  %s870_s30 = sphi %s928_s30, %s22_s30  }
   0x4   : > { %p247_p1 = scmp.lt.s32.totalorder %s870_s30, 3  ;;  %p700_p2 = scmp.eq.s32.totalorder %s934_s10, 0 }
   0x5   : > { %s275_s13 = sshll.u32 %s1018_s3, 4  ;;  %s258_s17 = sshll.u32 %s1016_s1, 4  ;;  %s276_s13 = int_to_ptr.hbm [resolvable:$true] %s275_s13  ;;  %s259_s17 = int_to_ptr.hbm [resolvable:$true] %s258_s17 }
   0x6   : > { %p942_p3 = pnand %p656_p0, %p247_p1  ;;  %s872_s18 = smov [#allocation4]  }
   0x7   : > { %s277_s19 = sshll.u32 %s872_s18, 4  ;;  %s873_s21 = smov [#allocation2]   ;;  %s278_s19 = int_to_ptr.vmem [resolvable:$true] %s277_s19 }
   0x8   : > { %p687_p4 = pneg %p942_p3  ;;  %s260_s22 = sshll.u32 %s873_s21, 4  ;;  %s261_s22 = int_to_ptr.vmem [resolvable:$true] %s260_s22 }
   0x9   : > { %s292_s25 = sshll.u32 %s1020_s5, 4  ;;  %s874_s26 = smov 128   ;;  %s293_s25 = int_to_ptr.hbm [resolvable:$true] %s292_s25 }
   0xa   : > { %p953_p5 = pnand %p700_p2, %p687_p4  ;;  %s875_s27 = smov 8  }
   0xb   : > { %s876_s28 = smov [#allocation6]   ;;  %s309_s15 = sshll.u32 %s1022_s7, 4  ;;  %s310_s15 = int_to_ptr.hbm [resolvable:$true] %s309_s15 }
   0xc   : > { %693 = dma.hbm_to_vmem [thread:$0]  (!%p953_p5), %s276_s13, 2048, %s278_s19, [#allocation5], %s874_s26, %s874_s26, %s875_s27  }
   0xd   : > { %690 = dma.hbm_to_vmem [thread:$0]  (!%p953_p5), %s259_s17, 2048, %s261_s22, [#allocation3], %s874_s26, %s874_s26, %s875_s27  }
   0xe   : > { %s294_s29 = sshll.u32 %s876_s28, 4  ;;  %s877_s16 = smov [#allocation7]   ;;  %s295_s29 = int_to_ptr.vmem [resolvable:$true] %s294_s29 }
   0xf   : > { %696 = dma.hbm_to_vmem [thread:$0]  (!%p953_p5), %s293_s25, 2048, %s295_s29, [#allocation5], %s874_s26, %s874_s26, %s875_s27  }
  0x10   : > { %s311_s18 = sshll.u32 %s877_s16, 4  ;;  %337 = sbr.rel (%p942_p3) target bundleno = 604 (0x25c), region = 56  ;;  %s312_s18 = int_to_ptr.vmem [resolvable:$true] %s311_s18 }
  0x11   : > { %699 = dma.hbm_to_vmem [thread:$0]  (!%p953_p5), %s310_s15, 2048, %s312_s18, [#allocation8], %s874_s26, %s874_s26, %s875_s27  }
  0x15   : > { %857 = dma.done.wait (%p700_p2), [#allocation3], 2048  }
  0x16   : > { %859 = vsyncadd (%p700_p2), [#allocation3], 4294965248 }
  0x17   : > { %861 = dma.done.wait (%p700_p2), [#allocation5], 4096  }
  0x18   : > { %863 = vsyncadd (%p700_p2), [#allocation5], 4294963200 }
  0x19   : > { %865 = dma.done.wait (%p700_p2), [#allocation8], 2048  }
  0x1a   : > { %867 = vsyncadd (%p700_p2), [#allocation8], 4294965248  ;;  %v411_v0 = vld [vmem:[#allocation2 + $0x78] sm:$0xff]  ;;  %v410_v1 = vld [vmem:[#allocation2 + $0x70] sm:$0xff]  ;;  %p387_p6 = scmp.lt.s32.totalorder %s934_s10, 1 }
  0x1b   : > { %416 = vmatpush.msra.mxu0 %v411_v0  ;;  %v409_v2 = vld [vmem:[#allocation2 + $0x68] sm:$0xff]  ;;  %v408_v3 = vld [vmem:[#allocation2 + $0x60] sm:$0xff]  ;;  %v452_v4 = vld [vmem:[#allocation4 + $0x78] sm:$0xff] }
  0x1c   : > { %v407_v5 = vld [vmem:[#allocation2 + $0x58] sm:$0xff]  ;;  %457 = vmatpush.msra.mxu1 %v452_v4  ;;  %v451_v6 = vld [vmem:[#allocation4 + $0x70] sm:$0xff]  ;;  %v450_v7 = vld [vmem:[#allocation4 + $0x68] sm:$0xff]  ;;  %s1028_s10 = smov (!%p387_p6, %s934_s10), 1 }
  0x1d   : > { %417 = vmatpush.msra.mxu0 %v410_v1  ;;  %v406_v8 = vld [vmem:[#allocation2 + $0x50] sm:$0xff]  ;;  %v405_v9 = vld [vmem:[#allocation2 + $0x48] sm:$0xff]  ;;  %v449_v10 = vld [vmem:[#allocation4 + $0x60] sm:$0xff]  ;;  %s667_s13 = sshll.u32 %s1028_s10, 3 }
  0x1e   : > { %458 = vmatpush.msra.mxu1 %v451_v6  ;;  %v448_v11 = vld [vmem:[#allocation4 + $0x58] sm:$0xff]  ;;  %v404_v12 = vld [vmem:[#allocation2 + $0x40] sm:$0xff]  ;;  %v447_v13 = vld [vmem:[#allocation4 + $0x50] sm:$0xff]  ;;  %s390_s19 = scalar_lea.vmem %s1015_s0, %s667_s13  ;;  %s394_s11 = scalar_lea.vmem %s1024_s9, %s667_s13 }
  0x1f   : > { %418 = vmatpush.msra.mxu0 %v409_v2  ;;  %v403_v14 = vld [vmem:[#allocation2 + $0x38] sm:$0xff]  ;;  %v446_v15 = vld [vmem:[#allocation4 + $0x48] sm:$0xff]  ;;  %v402_v16 = vld [vmem:[#allocation2 + $0x30] sm:$0xff] }
  0x20   : > { %459 = vmatpush.msra.mxu1 %v450_v7  ;;  %v445_v17 = vld [vmem:[#allocation4 + $0x40] sm:$0xff]  ;;  %v401_v18 = vld [vmem:[#allocation2 + $0x28] sm:$0xff]  ;;  %v444_v19 = vld [vmem:[#allocation4 + $0x38] sm:$0xff] }
  0x21   : > { %419 = vmatpush.msra.mxu0 %v408_v3  ;;  %v400_v20 = vld [vmem:[#allocation2 + $0x20] sm:$0xff]  ;;  %v443_v21 = vld [vmem:[#allocation4 + $0x30] sm:$0xff]  ;;  %v399_v22 = vld [vmem:[#allocation2 + $0x18] sm:$0xff] }
  0x22   : > { %460 = vmatpush.msra.mxu1 %v449_v10  ;;  %v442_v23 = vld [vmem:[#allocation4 + $0x28] sm:$0xff]  ;;  %v398_v24 = vld [vmem:[#allocation2 + $0x10] sm:$0xff]  ;;  %v396_v26 = vld [vmem:[#allocation2] sm:$0xff] }
  0x23   : > { %420 = vmatpush.msra.mxu0 %v407_v5  ;;  %v397_v25 = vld [vmem:[#allocation2 + $0x8] sm:$0xff]  ;;  %v395_v27 = vld [vmem:[%s390_s19] sm:$0xff]  ;;  %v440_v29 = vld [vmem:[#allocation4 + $0x18] sm:$0xff] }
  0x24   : > { %461 = vmatpush.msra.mxu1 %v448_v11  ;;  %v441_v28 = vld [vmem:[#allocation4 + $0x20] sm:$0xff]  ;;  %v439_v30 = vld [vmem:[#allocation4 + $0x10] sm:$0xff]  ;;  %v438_v31 = vld [vmem:[#allocation4 + $0x8] sm:$0xff] }
  0x25   : > { %421 = vmatpush.msra.mxu0 %v406_v8  ;;  %v437_v32 = vld [vmem:[#allocation4] sm:$0xff]  ;;  %v493_v33 = vld [vmem:[#allocation6 + $0x78] sm:$0xff]  ;;  %v492_v34 = vld [vmem:[#allocation6 + $0x70] sm:$0xff] }
  0x26   : > { %462 = vmatpush.msra.mxu1 %v447_v13  ;;  %498 = vmatpush.msra.mxu2 %v493_v33  ;;  %v491_v35 = vld [vmem:[#allocation6 + $0x68] sm:$0xff]  ;;  %v490_v36 = vld [vmem:[#allocation6 + $0x60] sm:$0xff]  ;;  %v489_v37 = vld [vmem:[#allocation6 + $0x58] sm:$0xff] }
  0x27   : > { %422 = vmatpush.msra.mxu0 %v405_v9  ;;  %v488_v38 = vld [vmem:[#allocation6 + $0x50] sm:$0xff]  ;;  %v487_v39 = vld [vmem:[#allocation6 + $0x48] sm:$0xff]  ;;  %v486_v40 = vld [vmem:[#allocation6 + $0x40] sm:$0xff] }
  0x28   : > { %463 = vmatpush.msra.mxu1 %v446_v15  ;;  %499 = vmatpush.msra.mxu2 %v492_v34  ;;  %v485_v41 = vld [vmem:[#allocation6 + $0x38] sm:$0xff]  ;;  %v484_v42 = vld [vmem:[#allocation6 + $0x30] sm:$0xff]  ;;  %v483_v43 = vld [vmem:[#allocation6 + $0x28] sm:$0xff] }
  0x29   : > { %423 = vmatpush.msra.mxu0 %v404_v12  ;;  %v722_v44 = vld [vmem:[%s1017_s2] ss:$0 sm:$0xff]  ;;  %v481_v49 = vld [vmem:[#allocation6 + $0x18] sm:$0xff]  ;;  %v480_v50 = vld [vmem:[#allocation6 + $0x10] sm:$0xff] }
  0x2a   : > { %464 = vmatpush.msra.mxu1 %v445_v17  ;;  %500 = vmatpush.msra.mxu2 %v491_v35  ;;  %v482_v48 = vld [vmem:[#allocation6 + $0x20] sm:$0xff]  ;;  %v479_v51 = vld [vmem:[#allocation6 + $0x8] sm:$0xff]  ;;  %v534_v53 = vld [vmem:[#allocation7 + $0x78] sm:$0xff] }
  0x2b   : > { %424 = vmatpush.msra.mxu0 %v403_v14  ;;  %v478_v52 = vld [vmem:[#allocation6] sm:$0xff]  ;;  %v533_v54 = vld [vmem:[#allocation7 + $0x70] sm:$0xff]  ;;  %539 = vmatpush.msra.mxu3 %v534_v53  ;;  %v532_v55 = vld [vmem:[#allocation7 + $0x68] sm:$0xff] }
  0x2c   : > { %465 = vmatpush.msra.mxu1 %v444_v19  ;;  %501 = vmatpush.msra.mxu2 %v490_v36  ;;  %v531_v56 = vld [vmem:[#allocation7 + $0x60] sm:$0xff]  ;;  %v530_v57 = vld [vmem:[#allocation7 + $0x58] sm:$0xff]  ;;  %v529_v58 = vld [vmem:[#allocation7 + $0x50] sm:$0xff] }
  0x2d   : > { %425 = vmatpush.msra.mxu0 %v402_v16  ;;  %540 = vmatpush.msra.mxu3 %v533_v54  ;;  %v528_v59 = vld [vmem:[#allocation7 + $0x48] sm:$0xff]  ;;  %v527_v60 = vld [vmem:[#allocation7 + $0x40] sm:$0xff]  ;;  %v526_v61 = vld [vmem:[#allocation7 + $0x38] sm:$0xff] }
  0x2e   : > { %466 = vmatpush.msra.mxu1 %v443_v21  ;;  %502 = vmatpush.msra.mxu2 %v489_v37  ;;  %v525_v62 = vld [vmem:[#allocation7 + $0x30] sm:$0xff]  ;;  %v524_v63 = vld [vmem:[#allocation7 + $0x28] sm:$0xff]  ;;  %v723_v0 = vld [vmem:[%s1019_s4] ss:$0 sm:$0xff] }
  0x2f   : > { %426 = vmatpush.msra.mxu0 %v401_v18  ;;  %541 = vmatpush.msra.mxu3 %v532_v55  ;;  %v523_v4 = vld [vmem:[#allocation7 + $0x20] sm:$0xff]  ;;  %v522_v5 = vld [vmem:[#allocation7 + $0x18] sm:$0xff]  ;;  %v521_v6 = vld [vmem:[#allocation7 + $0x10] sm:$0xff] }
  0x30   : > { %467 = vmatpush.msra.mxu1 %v442_v23  ;;  %503 = vmatpush.msra.mxu2 %v488_v38  ;;  %v520_v7 = vld [vmem:[#allocation7 + $0x8] sm:$0xff]  ;;  %v519_v8 = vld [vmem:[#allocation7] sm:$0xff] }
  0x31   : > { %427 = vmatpush.msra.mxu0 %v400_v20  ;;  %542 = vmatpush.msra.mxu3 %v531_v56  ;;  %v724_v9 = vld [vmem:[%s1021_s6] ss:$0 sm:$0xff] }
  0x32   : > { %468 = vmatpush.msra.mxu1 %v441_v28  ;;  %504 = vmatpush.msra.mxu2 %v487_v39  ;;  %v725_v13 = vld [vmem:[%s1023_s8] ss:$0 sm:$0xff] }
  0x33   : > { %428 = vmatpush.msra.mxu0 %v399_v22  ;;  %543 = vmatpush.msra.mxu3 %v530_v57 }
  0x34   : > { %469 = vmatpush.msra.mxu1 %v440_v29  ;;  %505 = vmatpush.msra.mxu2 %v486_v40 }
  0x35   : > { %429 = vmatpush.msra.mxu0 %v398_v24  ;;  %544 = vmatpush.msra.mxu3 %v529_v58 }
  0x36   : > { %470 = vmatpush.msra.mxu1 %v439_v30  ;;  %506 = vmatpush.msra.mxu2 %v485_v41 }
  0x37   : > { %430 = vmatpush.msra.mxu0 %v397_v25  ;;  %545 = vmatpush.msra.mxu3 %v528_v59 }
  0x38   : > { %471 = vmatpush.msra.mxu1 %v438_v31  ;;  %507 = vmatpush.msra.mxu2 %v484_v42 }
  0x39   : > { %431 = vmatpush.msra.mxu0 %v396_v26  ;;  %546 = vmatpush.msra.mxu3 %v527_v60 }
  0x3a   : > { %432 = vmatmul.f32.vlgmr.msra.gmra.mxu0 %v395_v27  ;;  %472 = vmatpush.msra.mxu1 %v437_v32 }
  0x3b   : > { %508 = vmatpush.msra.mxu2 %v483_v43  ;;  %547 = vmatpush.msra.mxu3 %v526_v61 }
  0x3d   : > { %509 = vmatpush.msra.mxu2 %v482_v48  ;;  %548 = vmatpush.msra.mxu3 %v525_v62 }
  0x3f   : > { %510 = vmatpush.msra.mxu2 %v481_v49  ;;  %549 = vmatpush.msra.mxu3 %v524_v63 }
  0x41   : > { %511 = vmatpush.msra.mxu2 %v480_v50  ;;  %550 = vmatpush.msra.mxu3 %v523_v4 }
  0x43   : > { %512 = vmatpush.msra.mxu2 %v479_v51  ;;  %551 = vmatpush.msra.mxu3 %v522_v5 }
  0x45   : > { %513 = vmatpush.msra.mxu2 %v478_v52  ;;  %552 = vmatpush.msra.mxu3 %v521_v6 }
  0x47   : > { %553 = vmatpush.msra.mxu3 %v520_v7 }
  0x49   : > { %554 = vmatpush.msra.mxu3 %v519_v8 }
  0xb7   : > { %v433_v45 = vpop.f32.mrf.mxu0 }
  0xb8   : > { %v434_v46 = vadd.f32 %v722_v44, %v433_v45 }
  0xba   : > { %726 = vtanh.f32 %v434_v46 }
  0xc0   : > { %v727_v47 = vpop.eup %726 }
  0xc1   : > { %473 = vmatmul.f32.vlgmr.msra.gmra.mxu1 %v727_v47 }
 0x13e   : > { %v474_v1 = vpop.f32.mrf.mxu1 }
 0x13f   : > { %v475_v2 = vadd.f32 %v723_v0, %v474_v1 }
 0x141   : > { %728 = vtanh.f32 %v475_v2 }
 0x147   : > { %v729_v3 = vpop.eup %728 }
 0x148   : > { %514 = vmatmul.f32.vlgmr.msra.gmra.mxu2 %v729_v3 }
 0x1cb   : > { %v515_v10 = vpop.f32.mrf.mxu2 }
 0x1cc   : > { %v516_v11 = vadd.f32 %v724_v9, %v515_v10 }
 0x1ce   : > { %730 = vtanh.f32 %v516_v11 }
 0x1d4   : > { %v731_v12 = vpop.eup %730 }
 0x1d5   : > { %555 = vmatmul.f32.vlgmr.msra.gmra.mxu3 %v731_v12 }
 0x258   : > { %v556_v14 = vpop.f32.mrf.mxu3 }
 0x259   : > { %v557_v15 = vadd.f32 %v725_v13, %v556_v14 }
 0x25b   : > { %559 = vst [vmem:[%s394_s11] sm:$0xff] %v557_v15 }
 0x25c PF: > { %s22_s30 = sadd.s32 1, %s870_s30  }
 0x25d   : > { %p19_p7 = scmp.ge.s32.totalorder %s22_s30, 4  }
 0x25f   :  { %21 = sbr.rel (!%p19_p7) target bundleno = 3 (0x3), region = 103 }
 0x264   :  { %579 = vsyncpa [#allocation3], 1 }
 0x265   :  { %581 = vsyncpa [#allocation3 + $0x1], 1 }
 0x266   :  { %582 = vsyncpa [#allocation5], 1 }
 0x267   :  { %583 = vsyncpa [#allocation8], 1 }

// kernel: decoder_forward.1
= control target key start
LH: loop header
LB: loop body
LE: loop exit
PB: predicated region body
PF: predicated region fallthrough
CT: control target
= control target key end

     0   :  { %14 = vsyncpa [#allocation3], 0  ;;  %s1015_s0 = inlined_call_operand.vmem [shape: f32[16,128], index: 0, kind: input, shape index: {}]   ;;  %s1016_s1 = inlined_call_operand.hbm [shape: f32[128,128], index: 1, kind: input, shape index: {}]   ;;  %s1017_s2 = inlined_call_operand.vmem [shape: f32[1,128], index: 2, kind: input, shape index: {}]   ;;  %s1018_s3 = inlined_call_operand.hbm [shape: f32[128,128], index: 3, kind: input, shape index: {}]   ;;  %s1019_s4 = inlined_call_operand.vmem [shape: f32[1,128], index: 4, kind: input, shape index: {}]   ;;  %s1020_s5 = inlined_call_operand.hbm [shape: f32[128,128], index: 5, kind: input, shape index: {}]   ;;  %s1021_s6 = inlined_call_operand.vmem [shape: f32[1,128], index: 6, kind: input, shape index: {}]   ;;  %s1022_s7 = inlined_call_operand.hbm [shape: f32[128,128], index: 7, kind: input, shape index: {}]   ;;  %s1023_s8 = inlined_call_operand.vmem [shape: f32[1,128], index: 8, kind: input, shape index: {}]   ;;  %s1024_s9 = inlined_call_operand.vmem [shape: f32[16,128], index: 9, kind: output, shape index: {}]  }
   0x1   :  { %15 = vsyncpa [#allocation5], 0 }
   0x2   :  { %16 = vsyncpa [#allocation8], 0  ;;  %s928_s30 = smov 0  }
   0x3 LB: > { %s934_s10 = sadd.s32 4294967295, %s870_s30   ;;  %p656_p0 = scmp.ge.s32.totalorder %s870_s30, 1  ;;  %s870_s30 = sphi %s928_s30, %s22_s30  }
   0x4   : > { %p247_p1 = scmp.lt.s32.totalorder %s870_s30, 3  ;;  %p700_p2 = scmp.eq.s32.totalorder %s934_s10, 0 }
   0x5   : > { %s275_s13 = sshll.u32 %s1018_s3, 4  ;;  %s258_s17 = sshll.u32 %s1016_s1, 4  ;;  %s276_s13 = int_to_ptr.hbm [resolvable:$true] %s275_s13  ;;  %s259_s17 = int_to_ptr.hbm [resolvable:$true] %s258_s17 }
   0x6   : > { %p942_p3 = pnand %p656_p0, %p247_p1  ;;  %s872_s18 = smov [#allocation4]  }
   0x7   : > { %s277_s19 = sshll.u32 %s872_s18, 4  ;;  %s873_s21 = smov [#allocation2]   ;;  %s278_s19 = int_to_ptr.vmem [resolvable:$true] %s277_s19 }
   0x8   : > { %p687_p4 = pneg %p942_p3  ;;  %s260_s22 = sshll.u32 %s873_s21, 4  ;;  %s261_s22 = int_to_ptr.vmem [resolvable:$true] %s260_s22 }
   0x9   : > { %s292_s25 = sshll.u32 %s1020_s5, 4  ;;  %s874_s26 = smov 128   ;;  %s293_s25 = int_to_ptr.hbm [resolvable:$true] %s292_s25 }
   0xa   : > { %p953_p5 = pnand %p700_p2, %p687_p4  ;;  %s875_s27 = smov 8  }
   0xb   : > { %s876_s28 = smov [#allocation6]   ;;  %s309_s15 = sshll.u32 %s1022_s7, 4  ;;  %s310_s15 = int_to_ptr.hbm [resolvable:$true] %s309_s15 }
   0xc   : > { %693 = dma.hbm_to_vmem [thread:$0]  (!%p953_p5), %s276_s13, 2048, %s278_s19, [#allocation5], %s874_s26, %s874_s26, %s875_s27  }
   0xd   : > { %690 = dma.hbm_to_vmem [thread:$0]  (!%p953_p5), %s259_s17, 2048, %s261_s22, [#allocation3], %s874_s26, %s874_s26, %s875_s27  }
   0xe   : > { %s294_s29 = sshll.u32 %s876_s28, 4  ;;  %s877_s16 = smov [#allocation7]   ;;  %s295_s29 = int_to_ptr.vmem [resolvable:$true] %s294_s29 }
   0xf   : > { %696 = dma.hbm_to_vmem [thread:$0]  (!%p953_p5), %s293_s25, 2048, %s295_s29, [#allocation5], %s874_s26, %s874_s26, %s875_s27  }
  0x10   : > { %s311_s18 = sshll.u32 %s877_s16, 4  ;;  %337 = sbr.rel (%p942_p3) target bundleno = 604 (0x25c), region = 56  ;;  %s312_s18 = int_to_ptr.vmem [resolvable:$true] %s311_s18 }
  0x11   : > { %699 = dma.hbm_to_vmem [thread:$0]  (!%p953_p5), %s310_s15, 2048, %s312_s18, [#allocation8], %s874_s26, %s874_s26, %s875_s27  }
  0x15   : > { %857 = dma.done.wait (%p700_p2), [#allocation3], 2048  }
  0x16   : > { %859 = vsyncadd (%p700_p2), [#allocation3], 4294965248 }
  0x17   : > { %861 = dma.done.wait (%p700_p2), [#allocation5], 4096  }
  0x18   : > { %863 = vsyncadd (%p700_p2), [#allocation5], 4294963200 }
  0x19   : > { %865 = dma.done.wait (%p700_p2), [#allocation8], 2048  }
  0x1a   : > { %867 = vsyncadd (%p700_p2), [#allocation8], 4294965248  ;;  %v411_v0 = vld [vmem:[#allocation2 + $0x78] sm:$0xff]  ;;  %v410_v1 = vld [vmem:[#allocation2 + $0x70] sm:$0xff]  ;;  %p387_p6 = scmp.lt.s32.totalorder %s934_s10, 1 }
  0x1b   : > { %416 = vmatpush.msra.mxu0 %v411_v0  ;;  %v409_v2 = vld [vmem:[#allocation2 + $0x68] sm:$0xff]  ;;  %v408_v3 = vld [vmem:[#allocation2 + $0x60] sm:$0xff]  ;;  %v452_v4 = vld [vmem:[#allocation4 + $0x78] sm:$0xff] }
  0x1c   : > { %v407_v5 = vld [vmem:[#allocation2 + $0x58] sm:$0xff]  ;;  %457 = vmatpush.msra.mxu1 %v452_v4  ;;  %v451_v6 = vld [vmem:[#allocation4 + $0x70] sm:$0xff]  ;;  %v450_v7 = vld [vmem:[#allocation4 + $0x68] sm:$0xff]  ;;  %s1028_s10 = smov (!%p387_p6, %s934_s10), 1 }
  0x1d   : > { %417 = vmatpush.msra.mxu0 %v410_v1  ;;  %v406_v8 = vld [vmem:[#allocation2 + $0x50] sm:$0xff]  ;;  %v405_v9 = vld [vmem:[#allocation2 + $0x48] sm:$0xff]  ;;  %v449_v10 = vld [vmem:[#allocation4 + $0x60] sm:$0xff]  ;;  %s667_s13 = sshll.u32 %s1028_s10, 3 }
  0x1e   : > { %458 = vmatpush.msra.mxu1 %v451_v6  ;;  %v448_v11 = vld [vmem:[#allocation4 + $0x58] sm:$0xff]  ;;  %v404_v12 = vld [vmem:[#allocation2 + $0x40] sm:$0xff]  ;;  %v447_v13 = vld [vmem:[#allocation4 + $0x50] sm:$0xff]  ;;  %s390_s19 = scalar_lea.vmem %s1015_s0, %s667_s13  ;;  %s394_s11 = scalar_lea.vmem %s1024_s9, %s667_s13 }
  0x1f   : > { %418 = vmatpush.msra.mxu0 %v409_v2  ;;  %v403_v14 = vld [vmem:[#allocation2 + $0x38] sm:$0xff]  ;;  %v446_v15 = vld [vmem:[#allocation4 + $0x48] sm:$0xff]  ;;  %v402_v16 = vld [vmem:[#allocation2 + $0x30] sm:$0xff] }
  0x20   : > { %459 = vmatpush.msra.mxu1 %v450_v7  ;;  %v445_v17 = vld [vmem:[#allocation4 + $0x40] sm:$0xff]  ;;  %v401_v18 = vld [vmem:[#allocation2 + $0x28] sm:$0xff]  ;;  %v444_v19 = vld [vmem:[#allocation4 + $0x38] sm:$0xff] }
  0x21   : > { %419 = vmatpush.msra.mxu0 %v408_v3  ;;  %v400_v20 = vld [vmem:[#allocation2 + $0x20] sm:$0xff]  ;;  %v443_v21 = vld [vmem:[#allocation4 + $0x30] sm:$0xff]  ;;  %v399_v22 = vld [vmem:[#allocation2 + $0x18] sm:$0xff] }
  0x22   : > { %460 = vmatpush.msra.mxu1 %v449_v10  ;;  %v442_v23 = vld [vmem:[#allocation4 + $0x28] sm:$0xff]  ;;  %v398_v24 = vld [vmem:[#allocation2 + $0x10] sm:$0xff]  ;;  %v396_v26 = vld [vmem:[#allocation2] sm:$0xff] }
  0x23   : > { %420 = vmatpush.msra.mxu0 %v407_v5  ;;  %v397_v25 = vld [vmem:[#allocation2 + $0x8] sm:$0xff]  ;;  %v395_v27 = vld [vmem:[%s390_s19] sm:$0xff]  ;;  %v440_v29 = vld [vmem:[#allocation4 + $0x18] sm:$0xff] }
  0x24   : > { %461 = vmatpush.msra.mxu1 %v448_v11  ;;  %v441_v28 = vld [vmem:[#allocation4 + $0x20] sm:$0xff]  ;;  %v439_v30 = vld [vmem:[#allocation4 + $0x10] sm:$0xff]  ;;  %v438_v31 = vld [vmem:[#allocation4 + $0x8] sm:$0xff] }
  0x25   : > { %421 = vmatpush.msra.mxu0 %v406_v8  ;;  %v437_v32 = vld [vmem:[#allocation4] sm:$0xff]  ;;  %v493_v33 = vld [vmem:[#allocation6 + $0x78] sm:$0xff]  ;;  %v492_v34 = vld [vmem:[#allocation6 + $0x70] sm:$0xff] }
  0x26   : > { %462 = vmatpush.msra.mxu1 %v447_v13  ;;  %498 = vmatpush.msra.mxu2 %v493_v33  ;;  %v491_v35 = vld [vmem:[#allocation6 + $0x68] sm:$0xff]  ;;  %v490_v36 = vld [vmem:[#allocation6 + $0x60] sm:$0xff]  ;;  %v489_v37 = vld [vmem:[#allocation6 + $0x58] sm:$0xff] }
  0x27   : > { %422 = vmatpush.msra.mxu0 %v405_v9  ;;  %v488_v38 = vld [vmem:[#allocation6 + $0x50] sm:$0xff]  ;;  %v487_v39 = vld [vmem:[#allocation6 + $0x48] sm:$0xff]  ;;  %v486_v40 = vld [vmem:[#allocation6 + $0x40] sm:$0xff] }
  0x28   : > { %463 = vmatpush.msra.mxu1 %v446_v15  ;;  %499 = vmatpush.msra.mxu2 %v492_v34  ;;  %v485_v41 = vld [vmem:[#allocation6 + $0x38] sm:$0xff]  ;;  %v484_v42 = vld [vmem:[#allocation6 + $0x30] sm:$0xff]  ;;  %v483_v43 = vld [vmem:[#allocation6 + $0x28] sm:$0xff] }
  0x29   : > { %423 = vmatpush.msra.mxu0 %v404_v12  ;;  %v722_v44 = vld [vmem:[%s1017_s2] ss:$0 sm:$0xff]  ;;  %v481_v49 = vld [vmem:[#allocation6 + $0x18] sm:$0xff]  ;;  %v480_v50 = vld [vmem:[#allocation6 + $0x10] sm:$0xff] }
  0x2a   : > { %464 = vmatpush.msra.mxu1 %v445_v17  ;;  %500 = vmatpush.msra.mxu2 %v491_v35  ;;  %v482_v48 = vld [vmem:[#allocation6 + $0x20] sm:$0xff]  ;;  %v479_v51 = vld [vmem:[#allocation6 + $0x8] sm:$0xff]  ;;  %v534_v53 = vld [vmem:[#allocation7 + $0x78] sm:$0xff] }
  0x2b   : > { %424 = vmatpush.msra.mxu0 %v403_v14  ;;  %v478_v52 = vld [vmem:[#allocation6] sm:$0xff]  ;;  %v533_v54 = vld [vmem:[#allocation7 + $0x70] sm:$0xff]  ;;  %539 = vmatpush.msra.mxu3 %v534_v53  ;;  %v532_v55 = vld [vmem:[#allocation7 + $0x68] sm:$0xff] }
  0x2c   : > { %465 = vmatpush.msra.mxu1 %v444_v19  ;;  %501 = vmatpush.msra.mxu2 %v490_v36  ;;  %v531_v56 = vld [vmem:[#allocation7 + $0x60] sm:$0xff]  ;;  %v530_v57 = vld [vmem:[#allocation7 + $0x58] sm:$0xff]  ;;  %v529_v58 = vld [vmem:[#allocation7 + $0x50] sm:$0xff] }
  0x2d   : > { %425 = vmatpush.msra.mxu0 %v402_v16  ;;  %540 = vmatpush.msra.mxu3 %v533_v54  ;;  %v528_v59 = vld [vmem:[#allocation7 + $0x48] sm:$0xff]  ;;  %v527_v60 = vld [vmem:[#allocation7 + $0x40] sm:$0xff]  ;;  %v526_v61 = vld [vmem:[#allocation7 + $0x38] sm:$0xff] }
  0x2e   : > { %466 = vmatpush.msra.mxu1 %v443_v21  ;;  %502 = vmatpush.msra.mxu2 %v489_v37  ;;  %v525_v62 = vld [vmem:[#allocation7 + $0x30] sm:$0xff]  ;;  %v524_v63 = vld [vmem:[#allocation7 + $0x28] sm:$0xff]  ;;  %v723_v0 = vld [vmem:[%s1019_s4] ss:$0 sm:$0xff] }
  0x2f   : > { %426 = vmatpush.msra.mxu0 %v401_v18  ;;  %541 = vmatpush.msra.mxu3 %v532_v55  ;;  %v523_v4 = vld [vmem:[#allocation7 + $0x20] sm:$0xff]  ;;  %v522_v5 = vld [vmem:[#allocation7 + $0x18] sm:$0xff]  ;;  %v521_v6 = vld [vmem:[#allocation7 + $0x10] sm:$0xff] }
  0x30   : > { %467 = vmatpush.msra.mxu1 %v442_v23  ;;  %503 = vmatpush.msra.mxu2 %v488_v38  ;;  %v520_v7 = vld [vmem:[#allocation7 + $0x8] sm:$0xff]  ;;  %v519_v8 = vld [vmem:[#allocation7] sm:$0xff] }
  0x31   : > { %427 = vmatpush.msra.mxu0 %v400_v20  ;;  %542 = vmatpush.msra.mxu3 %v531_v56  ;;  %v724_v9 = vld [vmem:[%s1021_s6] ss:$0 sm:$0xff] }
  0x32   : > { %468 = vmatpush.msra.mxu1 %v441_v28  ;;  %504 = vmatpush.msra.mxu2 %v487_v39  ;;  %v725_v13 = vld [vmem:[%s1023_s8] ss:$0 sm:$0xff] }
  0x33   : > { %428 = vmatpush.msra.mxu0 %v399_v22  ;;  %543 = vmatpush.msra.mxu3 %v530_v57 }
  0x34   : > { %469 = vmatpush.msra.mxu1 %v440_v29  ;;  %505 = vmatpush.msra.mxu2 %v486_v40 }
  0x35   : > { %429 = vmatpush.msra.mxu0 %v398_v24  ;;  %544 = vmatpush.msra.mxu3 %v529_v58 }
  0x36   : > { %470 = vmatpush.msra.mxu1 %v439_v30  ;;  %506 = vmatpush.msra.mxu2 %v485_v41 }
  0x37   : > { %430 = vmatpush.msra.mxu0 %v397_v25  ;;  %545 = vmatpush.msra.mxu3 %v528_v59 }
  0x38   : > { %471 = vmatpush.msra.mxu1 %v438_v31  ;;  %507 = vmatpush.msra.mxu2 %v484_v42 }
  0x39   : > { %431 = vmatpush.msra.mxu0 %v396_v26  ;;  %546 = vmatpush.msra.mxu3 %v527_v60 }
  0x3a   : > { %432 = vmatmul.f32.vlgmr.msra.gmra.mxu0 %v395_v27  ;;  %472 = vmatpush.msra.mxu1 %v437_v32 }
  0x3b   : > { %508 = vmatpush.msra.mxu2 %v483_v43  ;;  %547 = vmatpush.msra.mxu3 %v526_v61 }
  0x3d   : > { %509 = vmatpush.msra.mxu2 %v482_v48  ;;  %548 = vmatpush.msra.mxu3 %v525_v62 }
  0x3f   : > { %510 = vmatpush.msra.mxu2 %v481_v49  ;;  %549 = vmatpush.msra.mxu3 %v524_v63 }
  0x41   : > { %511 = vmatpush.msra.mxu2 %v480_v50  ;;  %550 = vmatpush.msra.mxu3 %v523_v4 }
  0x43   : > { %512 = vmatpush.msra.mxu2 %v479_v51  ;;  %551 = vmatpush.msra.mxu3 %v522_v5 }
  0x45   : > { %513 = vmatpush.msra.mxu2 %v478_v52  ;;  %552 = vmatpush.msra.mxu3 %v521_v6 }
  0x47   : > { %553 = vmatpush.msra.mxu3 %v520_v7 }
  0x49   : > { %554 = vmatpush.msra.mxu3 %v519_v8 }
  0xb7   : > { %v433_v45 = vpop.f32.mrf.mxu0 }
  0xb8   : > { %v434_v46 = vadd.f32 %v722_v44, %v433_v45 }
  0xba   : > { %726 = vtanh.f32 %v434_v46 }
  0xc0   : > { %v727_v47 = vpop.eup %726 }
  0xc1   : > { %473 = vmatmul.f32.vlgmr.msra.gmra.mxu1 %v727_v47 }
 0x13e   : > { %v474_v1 = vpop.f32.mrf.mxu1 }
 0x13f   : > { %v475_v2 = vadd.f32 %v723_v0, %v474_v1 }
 0x141   : > { %728 = vtanh.f32 %v475_v2 }
 0x147   : > { %v729_v3 = vpop.eup %728 }
 0x148   : > { %514 = vmatmul.f32.vlgmr.msra.gmra.mxu2 %v729_v3 }
 0x1cb   : > { %v515_v10 = vpop.f32.mrf.mxu2 }
 0x1cc   : > { %v516_v11 = vadd.f32 %v724_v9, %v515_v10 }
 0x1ce   : > { %730 = vtanh.f32 %v516_v11 }
 0x1d4   : > { %v731_v12 = vpop.eup %730 }
 0x1d5   : > { %555 = vmatmul.f32.vlgmr.msra.gmra.mxu3 %v731_v12 }
 0x258   : > { %v556_v14 = vpop.f32.mrf.mxu3 }
 0x259   : > { %v557_v15 = vadd.f32 %v725_v13, %v556_v14 }
 0x25b   : > { %559 = vst [vmem:[%s394_s11] sm:$0xff] %v557_v15 }
 0x25c PF: > { %s22_s30 = sadd.s32 1, %s870_s30  }
 0x25d   : > { %p19_p7 = scmp.ge.s32.totalorder %s22_s30, 4  }
 0x25f   :  { %21 = sbr.rel (!%p19_p7) target bundleno = 3 (0x3), region = 103 }
 0x264   :  { %579 = vsyncpa [#allocation3], 1 }
 0x265   :  { %581 = vsyncpa [#allocation3 + $0x1], 1 }
 0x266   :  { %582 = vsyncpa [#allocation5], 1 }
 0x267   :  { %583 = vsyncpa [#allocation8], 1 }

</bundles_post_ra>
